<compile_context>
chip_gen: v7x
topology: tpu7x:2x2x1
jax: 0.10.0
libtpu: 0.0.40
codegen_flags: <defaults>
</compile_context>

<pallas_src>
import jax
import jax.numpy as jnp
from jax.experimental import pallas as pl
from jax.experimental.pallas import tpu as pltpu

EPS = 1e-5  # nn.GroupNorm default eps


def _round_up(x, m):
    return (x + m - 1) // m * m


def _vmem_budgets():
    """(vmem_limit_bytes, per-block byte budget) derived from chip VMEM."""
    cap = 64 << 20  # conservative default (v7x-sized) if the query fails
    try:
        cap = int(getattr(pltpu.get_tpu_info(), "vmem_capacity_bytes", cap))
    except Exception:
        pass
    vmem_limit = min(cap // 2, 64 << 20)          # 32 MiB on v7x, 64 MiB on v5e/v6e
    block_budget = min(vmem_limit // 6, 8 << 20)  # in+out double-buffered + f32 staging
    return vmem_limit, block_budget


def _pick_bn(N, unit_bytes, budget, cap=8):
    """Samples per grid step: amortize per-step overhead but keep >= 2 grid
    steps whenever N >= 2 so both v7x TensorCores get work."""
    bn = 1
    while (bn * 2 <= cap and bn * 2 <= max(N, 1)
           and bn * 2 * unit_bytes <= budget
           and (N < 2 or -(-N // (bn * 2)) >= 2)):
        bn *= 2
    return bn


def _conv_mix(wg, xb, C):
    """(C, C) @ (C, P) -> (C, P) in f32. Rank-1 FMA unroll for tiny C (avoids
    MXU push/pop for a tiny contraction and any (C, C, P) broadcast
    intermediate); MXU jnp.dot otherwise."""
    if C >= 16:
        return jnp.dot(wg, xb, preferred_element_type=jnp.float32)
    yb = wg[:, 0:1] * xb[0:1, :]
    for c in range(1, C):
        yb = yb + wg[:, c:c + 1] * xb[c:c + 1, :]
    return yb


def prenorm_conv1x1(x, gamma, beta, w, wb):
    """PreNorm(dim, Conv2d(dim, dim, 1)) forward. x: (N, C, H, W) -> (N, C, H, W)."""
    N, C, H, W = x.shape
    HW = H * W
    elem = jnp.dtype(x.dtype).itemsize
    hw_pad = _round_up(HW, 128)
    vmem_limit, block_budget = _vmem_budgets()

    # Fold GroupNorm affine into the 1x1-conv weight (tiny CxC work in XLA):
    #   y = inv * (W_g @ x) - (inv * mean) * rowsum(W_g) + (W @ beta + wb)
    gamma32 = gamma.astype(jnp.float32)
    beta32 = beta.astype(jnp.float32)
    w32 = w.astype(jnp.float32)
    w_g = w32 * gamma32[None, :]                                        # (C, C) f32
    rowsum_wg = jnp.sum(w_g, axis=1, keepdims=True)                     # (C, 1) f32
    const_bias = (w32 @ beta32 + wb.astype(jnp.float32)).reshape(C, 1)  # (C, 1) f32

    inv_count = 1.0 / float(C * HW)  # real (unpadded) element count per sample
    x_flat = x.reshape(N, C, HW)

    sample_bytes = C * hw_pad * elem

    if sample_bytes <= block_budget:
        # -------- Fused single pass: stats + folded conv on the resident block
        bn = _pick_bn(N, sample_bytes, block_budget)
        n_pad = _round_up(N, bn)
        if n_pad != N or hw_pad != HW:
            # Zero padding is exact: padded lanes/rows contribute 0 to the sums
            # (we divide by the real count) and are sliced off afterwards.
            x_flat = jnp.pad(x_flat, ((0, n_pad - N), (0, 0), (0, hw_pad - HW)))
        nb = n_pad // bn

        def fused_kernel(x_ref, wg_ref, rs_ref, cb_ref, o_ref):
            wg = wg_ref[...]                           # (C, C) f32
            rs = rs_ref[...]                           # (C, 1) f32
            cb = cb_ref[...]                           # (C, 1) f32
            for b in range(bn):                        # static unroll, bn <= 8
                xb = x_ref[b].astype(jnp.float32)      # (C, hw_pad)
                s1 = jnp.sum(jnp.sum(xb, axis=1, keepdims=True),
                             axis=0, keepdims=True)    # (1, 1)
                s2 = jnp.sum(jnp.sum(xb * xb, axis=1, keepdims=True),
                             axis=0, keepdims=True)    # (1, 1)
                mean = s1 * inv_count
                var = jnp.maximum(s2 * inv_count - mean * mean, 0.0)  # clamp
                inv = jax.lax.rsqrt(var + EPS)         # (1, 1), EUP rsqrt
                yb = _conv_mix(wg, xb, C)              # (C, hw_pad) f32
                shift = cb - (inv * mean) * rs         # (C, 1)
                o_ref[b] = (inv * yb + shift).astype(o_ref.dtype)

        out = pl.pallas_call(
            fused_kernel,
            out_shape=jax.ShapeDtypeStruct((n_pad, C, hw_pad), x.dtype),
            grid_spec=pltpu.PrefetchScalarGridSpec(
                num_scalar_prefetch=0,
                grid=(nb,),
                in_specs=[
                    pl.BlockSpec((bn, C, hw_pad), lambda b: (b, 0, 0)),  # x
                    pl.BlockSpec((C, C), lambda b: (0, 0)),              # W * gamma
                    pl.BlockSpec((C, 1), lambda b: (0, 0)),              # rowsum(W_g)
                    pl.BlockSpec((C, 1), lambda b: (0, 0)),              # W@beta + wb
                ],
                out_specs=pl.BlockSpec((bn, C, hw_pad), lambda b: (b, 0, 0)),
            ),
            compiler_params=pltpu.CompilerParams(
                dimension_semantics=("parallel",),
                vmem_limit_bytes=vmem_limit,
            ),
        )(x_flat, w_g, rowsum_wg, const_bias)
        return out[:N, :, :HW].reshape(N, C, H, W)

    # -------- Fallback: two passes when one sample exceeds the VMEM budget ----
    lane = 128
    while lane * 2 <= hw_pad and C * (lane * 2) * elem <= block_budget:
        lane *= 2                               # grow lane (DMA size) before bn
    hw_pad = _round_up(HW, lane)
    bn = _pick_bn(N, C * lane * elem, block_budget)
    n_pad = _round_up(N, bn)
    if n_pad != N or hw_pad != HW:
        x_flat = jnp.pad(x_flat, ((0, n_pad - N), (0, 0), (0, hw_pad - HW)))
    nb, nt = n_pad // bn, hw_pad // lane

    def stats_kernel(x_ref, mean_ref, inv_ref, s1_ref, s2_ref):
        t = pl.program_id(1)

        @pl.when(t == 0)
        def _init():
            s1_ref[...] = jnp.zeros_like(s1_ref)
            s2_ref[...] = jnp.zeros_like(s2_ref)

        xv = x_ref[...].astype(jnp.float32)             # (bn, C, lane)
        # Per-lane partial sums; the cross-lane XLU reduce is deferred to the end.
        s1_ref[...] += jnp.sum(xv, axis=1)              # (bn, lane)
        s2_ref[...] += jnp.sum(xv * xv, axis=1)

        @pl.when(t == pl.num_programs(1) - 1)
        def _finalize():
            s1 = jnp.sum(s1_ref[...], axis=1, keepdims=True)   # (bn, 1)
            s2 = jnp.sum(s2_ref[...], axis=1, keepdims=True)
            mean = s1 * inv_count
            var = jnp.maximum(s2 * inv_count - mean * mean, 0.0)
            mean_ref[...] = mean
            inv_ref[...] = jax.lax.rsqrt(var + EPS)

    mean, inv = pl.pallas_call(
        stats_kernel,
        out_shape=(jax.ShapeDtypeStruct((n_pad, 1), jnp.float32),
                   jax.ShapeDtypeStruct((n_pad, 1), jnp.float32)),
        grid_spec=pltpu.PrefetchScalarGridSpec(
            num_scalar_prefetch=0,
            grid=(nb, nt),
            in_specs=[pl.BlockSpec((bn, C, lane), lambda b, t: (b, 0, t))],
            out_specs=(pl.BlockSpec((bn, 1), lambda b, t: (b, 0)),
                       pl.BlockSpec((bn, 1), lambda b, t: (b, 0))),
            scratch_shapes=[pltpu.VMEM((bn, lane), jnp.float32),
                            pltpu.VMEM((bn, lane), jnp.float32)],
        ),
        compiler_params=pltpu.CompilerParams(
            dimension_semantics=("parallel", "arbitrary"),
            vmem_limit_bytes=vmem_limit,
        ),
    )(x_flat)

    def apply_kernel(x_ref, mean_ref, inv_ref, wg_ref, rs_ref, cb_ref, o_ref):
        mean_v = mean_ref[...]      # (bn, 1) f32
        inv_v = inv_ref[...]        # (bn, 1) f32
        wg = wg_ref[...]            # (C, C)  f32
        rs = rs_ref[...]            # (C, 1)  f32
        cb = cb_ref[...]            # (C, 1)  f32
        # Per-sample output shift, hoisted out of the unrolled b loop.
        shift = cb[None, :, :] - (inv_v * mean_v)[:, :, None] * rs[None, :, :]
        for b in range(bn):         # static unroll, bn <= 8
            yb = _conv_mix(wg, x_ref[b].astype(jnp.float32), C)   # (C, lane)
            o_ref[b] = (inv_v[b:b + 1, :] * yb + shift[b]).astype(o_ref.dtype)

    out = pl.pallas_call(
        apply_kernel,
        out_shape=jax.ShapeDtypeStruct((n_pad, C, hw_pad), x.dtype),
        grid_spec=pltpu.PrefetchScalarGridSpec(
            num_scalar_prefetch=0,
            grid=(nb, nt),
            in_specs=[
                pl.BlockSpec((bn, C, lane), lambda b, t: (b, 0, t)),  # x tile
                pl.BlockSpec((bn, 1), lambda b, t: (b, 0)),           # mean
                pl.BlockSpec((bn, 1), lambda b, t: (b, 0)),           # inv
                pl.BlockSpec((C, C), lambda b, t: (0, 0)),            # W * gamma
                pl.BlockSpec((C, 1), lambda b, t: (0, 0)),            # rowsum(W_g)
                pl.BlockSpec((C, 1), lambda b, t: (0, 0)),            # W@beta + wb
            ],
            out_specs=pl.BlockSpec((bn, C, lane), lambda b, t: (b, 0, t)),
        ),
        compiler_params=pltpu.CompilerParams(
            dimension_semantics=("parallel", "parallel"),
            vmem_limit_bytes=vmem_limit,
        ),
    )(x_flat, mean, inv, w_g, rowsum_wg, const_bias)

    return out[:N, :, :HW].reshape(N, C, H, W)


def prenorm_reference(x, gamma, beta, w, wb):
    """Pure-JAX reference matching PyTorch GroupNorm(1, C) + Conv2d(C, C, 1)."""
    N, C, H, W = x.shape
    xf = x.reshape(N, -1)
    mean = xf.mean(axis=1).reshape(N, 1, 1, 1)
    var = ((xf - xf.mean(axis=1, keepdims=True)) ** 2).mean(axis=1).reshape(N, 1, 1, 1)
    xn = (x - mean) / jnp.sqrt(var + EPS)
    xn = xn * gamma.reshape(1, C, 1, 1) + beta.reshape(1, C, 1, 1)
    y = jnp.einsum("oc,nchw->nohw", w, xn) + wb.reshape(1, C, 1, 1)
    return y


if __name__ == "__main__":
    key = jax.random.PRNGKey(0)
    N, C, H, W = 2, 4, 16, 16  # dim = 4

    kx, kw, kb = jax.random.split(key, 3)
    x = jax.random.normal(kx, (N, C, H, W), dtype=jnp.float32)

    # GroupNorm affine params (PyTorch init: gamma=1, beta=0). Use non-trivial
    # values so the folded-affine path is actually exercised.
    gamma = 1.0 + 0.1 * jax.random.normal(jax.random.PRNGKey(1), (C,), dtype=jnp.float32)
    beta = 0.1 * jax.random.normal(jax.random.PRNGKey(2), (C,), dtype=jnp.float32)

    # fn = Conv2d(C, C, kernel_size=1) params, deterministic init.
    fan_in = float(C)  # 1x1 kernel
    bound = 1.0 / (fan_in ** 0.5)
    w = jax.random.uniform(kw, (C, C), minval=-bound, maxval=bound, dtype=jnp.float32)
    wb = jax.random.uniform(kb, (C,), minval=-bound, maxval=bound, dtype=jnp.float32)

    out = prenorm_conv1x1(x, gamma, beta, w, wb)
    out = jax.block_until_ready(out)

    ref = prenorm_reference(x, gamma, beta, w, wb)
    assert out.shape == (N, C, H, W)
    assert jnp.allclose(out, ref, atol=1e-4, rtol=1e-4), "mismatch vs reference"

    print("KERNEL_OK")
</pallas_src>

<mosaic_0001>
module attributes {stable_mosaic.version = 11 : i64} {
  func.func @fused_kernel(%arg0: i32, %arg1: memref<1x4x256xf32, #tpu.memory_space<vmem>>, %arg2: memref<4x4xf32, #tpu.memory_space<vmem>>, %arg3: memref<4x1xf32, #tpu.memory_space<vmem>>, %arg4: memref<4x1xf32, #tpu.memory_space<vmem>>, %arg5: memref<1x4x256xf32, #tpu.memory_space<vmem>>) attributes {dimension_semantics = [#tpu.dimension_semantics<parallel>], iteration_bounds = array<i64: 2>, scalar_prefetch = 0 : i64, scratch_operands = 0 : i64, tpu.core_type = #tpu.core_type<tc>, window_params = [{transform_indices = @transform_0, window_bounds = array<i64: 1, 4, 256>}, {pipeline_mode = #tpu.pipeline_mode<synchronous>, transform_indices = @transform_1, window_bounds = array<i64: 4, 4>}, {pipeline_mode = #tpu.pipeline_mode<synchronous>, transform_indices = @transform_2, window_bounds = array<i64: 4, 1>}, {pipeline_mode = #tpu.pipeline_mode<synchronous>, transform_indices = @transform_3, window_bounds = array<i64: 4, 1>}, {transform_indices = @transform_4, window_bounds = array<i64: 1, 4, 256>}]} {
    %c0 = arith.constant 0 : index
    %c0_0 = arith.constant 0 : index
    %0 = vector.load %arg2[%c0, %c0_0] : memref<4x4xf32, #tpu.memory_space<vmem>>, vector<4x4xf32>
    %c0_1 = arith.constant 0 : index
    %c0_2 = arith.constant 0 : index
    %1 = vector.load %arg3[%c0_1, %c0_2] : memref<4x1xf32, #tpu.memory_space<vmem>>, vector<4x1xf32>
    %c0_3 = arith.constant 0 : index
    %c0_4 = arith.constant 0 : index
    %2 = vector.load %arg4[%c0_3, %c0_4] : memref<4x1xf32, #tpu.memory_space<vmem>>, vector<4x1xf32>
    %c0_5 = arith.constant 0 : index
    %c0_6 = arith.constant 0 : index
    %c0_7 = arith.constant 0 : index
    %3 = vector.load %arg1[%c0_5, %c0_6, %c0_7] : memref<1x4x256xf32, #tpu.memory_space<vmem>>, vector<1x4x256xf32>
    %4 = vector.shape_cast %3 : vector<1x4x256xf32> to vector<4x256xf32>
    %cst = arith.constant dense<0.000000e+00> : vector<4xf32>
    %5 = vector.multi_reduction <add>, %4, %cst [1] : vector<4x256xf32> to vector<4xf32>
    %6 = vector.shape_cast %5 : vector<4xf32> to vector<4x1xf32>
    %cst_8 = arith.constant dense<0.000000e+00> : vector<1xf32>
    %7 = vector.multi_reduction <add>, %6, %cst_8 [0] : vector<4x1xf32> to vector<1xf32>
    %8 = vector.shape_cast %7 : vector<1xf32> to vector<1x1xf32>
    %9 = arith.mulf %4, %4 : vector<4x256xf32>
    %cst_9 = arith.constant dense<0.000000e+00> : vector<4xf32>
    %10 = vector.multi_reduction <add>, %9, %cst_9 [1] : vector<4x256xf32> to vector<4xf32>
    %11 = vector.shape_cast %10 : vector<4xf32> to vector<4x1xf32>
    %cst_10 = arith.constant dense<0.000000e+00> : vector<1xf32>
    %12 = vector.multi_reduction <add>, %11, %cst_10 [0] : vector<4x1xf32> to vector<1xf32>
    %13 = vector.shape_cast %12 : vector<1xf32> to vector<1x1xf32>
    %cst_11 = arith.constant 9.765625E-4 : f32
    %14 = vector.broadcast %cst_11 : f32 to vector<1x1xf32>
    %15 = arith.mulf %8, %14 : vector<1x1xf32>
    %cst_12 = arith.constant 9.765625E-4 : f32
    %16 = vector.broadcast %cst_12 : f32 to vector<1x1xf32>
    %17 = arith.mulf %13, %16 : vector<1x1xf32>
    %18 = arith.mulf %15, %15 : vector<1x1xf32>
    %19 = arith.subf %17, %18 : vector<1x1xf32>
    %cst_13 = arith.constant 0.000000e+00 : f32
    %20 = vector.broadcast %cst_13 : f32 to vector<1x1xf32>
    %21 = arith.maximumf %19, %20 : vector<1x1xf32>
    %cst_14 = arith.constant 9.99999974E-6 : f32
    %22 = vector.broadcast %cst_14 : f32 to vector<1x1xf32>
    %23 = arith.addf %21, %22 : vector<1x1xf32>
    %24 = math.rsqrt %23 : vector<1x1xf32>
    %25 = vector.extract_strided_slice %0 {offsets = [0, 0], sizes = [4, 1], strides = [1, 1]} : vector<4x4xf32> to vector<4x1xf32>
    %26 = vector.extract_strided_slice %4 {offsets = [0, 0], sizes = [1, 256], strides = [1, 1]} : vector<4x256xf32> to vector<1x256xf32>
    %27 = vector.broadcast %25 : vector<4x1xf32> to vector<4x256xf32>
    %28 = vector.broadcast %26 : vector<1x256xf32> to vector<4x256xf32>
    %29 = arith.mulf %27, %28 : vector<4x256xf32>
    %30 = vector.extract_strided_slice %0 {offsets = [0, 1], sizes = [4, 1], strides = [1, 1]} : vector<4x4xf32> to vector<4x1xf32>
    %31 = vector.extract_strided_slice %4 {offsets = [1, 0], sizes = [1, 256], strides = [1, 1]} : vector<4x256xf32> to vector<1x256xf32>
    %32 = vector.broadcast %30 : vector<4x1xf32> to vector<4x256xf32>
    %33 = vector.broadcast %31 : vector<1x256xf32> to vector<4x256xf32>
    %34 = arith.mulf %32, %33 : vector<4x256xf32>
    %35 = arith.addf %29, %34 : vector<4x256xf32>
    %36 = vector.extract_strided_slice %0 {offsets = [0, 2], sizes = [4, 1], strides = [1, 1]} : vector<4x4xf32> to vector<4x1xf32>
    %37 = vector.extract_strided_slice %4 {offsets = [2, 0], sizes = [1, 256], strides = [1, 1]} : vector<4x256xf32> to vector<1x256xf32>
    %38 = vector.broadcast %36 : vector<4x1xf32> to vector<4x256xf32>
    %39 = vector.broadcast %37 : vector<1x256xf32> to vector<4x256xf32>
    %40 = arith.mulf %38, %39 : vector<4x256xf32>
    %41 = arith.addf %35, %40 : vector<4x256xf32>
    %42 = vector.extract_strided_slice %0 {offsets = [0, 3], sizes = [4, 1], strides = [1, 1]} : vector<4x4xf32> to vector<4x1xf32>
    %43 = vector.extract_strided_slice %4 {offsets = [3, 0], sizes = [1, 256], strides = [1, 1]} : vector<4x256xf32> to vector<1x256xf32>
    %44 = vector.broadcast %42 : vector<4x1xf32> to vector<4x256xf32>
    %45 = vector.broadcast %43 : vector<1x256xf32> to vector<4x256xf32>
    %46 = arith.mulf %44, %45 : vector<4x256xf32>
    %47 = arith.addf %41, %46 : vector<4x256xf32>
    %48 = arith.mulf %24, %15 : vector<1x1xf32>
    %49 = vector.broadcast %48 : vector<1x1xf32> to vector<4x1xf32>
    %50 = arith.mulf %49, %1 : vector<4x1xf32>
    %51 = arith.subf %2, %50 : vector<4x1xf32>
    %52 = vector.broadcast %24 : vector<1x1xf32> to vector<4x256xf32>
    %53 = arith.mulf %52, %47 : vector<4x256xf32>
    %54 = vector.broadcast %51 : vector<4x1xf32> to vector<4x256xf32>
    %55 = arith.addf %53, %54 : vector<4x256xf32>
    %c0_15 = arith.constant 0 : index
    %c0_16 = arith.constant 0 : index
    %c0_17 = arith.constant 0 : index
    %56 = vector.load %arg5[%c0_15, %c0_16, %c0_17] : memref<1x4x256xf32, #tpu.memory_space<vmem>>, vector<1x4x256xf32>
    %57 = vector.shape_cast %56 : vector<1x4x256xf32> to vector<4x256xf32>
    %58 = vector.shape_cast %55 : vector<4x256xf32> to vector<1x4x256xf32>
    tpu.vector_store %arg5[%c0_15, %c0_16, %c0_17], %58 {strides = array<i32>} : memref<1x4x256xf32, #tpu.memory_space<vmem>>, vector<1x4x256xf32>,
    return
  }
  func.func @transform_0(%arg0: i32) -> (i32, i32, i32) {
    %c0_i32 = arith.constant 0 : i32
    %c0_i32_0 = arith.constant 0 : i32
    %c0_i32_1 = arith.constant 0 : i32
    return %arg0, %c0_i32, %c0_i32_0 : i32, i32, i32
  }
  func.func @transform_1(%arg0: i32) -> (i32, i32) {
    %c0_i32 = arith.constant 0 : i32
    %c0_i32_0 = arith.constant 0 : i32
    %c0_i32_1 = arith.constant 0 : i32
    return %c0_i32, %c0_i32_0 : i32, i32
  }
  func.func @transform_2(%arg0: i32) -> (i32, i32) {
    %c0_i32 = arith.constant 0 : i32
    %c0_i32_0 = arith.constant 0 : i32
    %c0_i32_1 = arith.constant 0 : i32
    return %c0_i32, %c0_i32_0 : i32, i32
  }
  func.func @transform_3(%arg0: i32) -> (i32, i32) {
    %c0_i32 = arith.constant 0 : i32
    %c0_i32_0 = arith.constant 0 : i32
    %c0_i32_1 = arith.constant 0 : i32
    return %c0_i32, %c0_i32_0 : i32, i32
  }
  func.func @transform_4(%arg0: i32) -> (i32, i32, i32) {
    %c0_i32 = arith.constant 0 : i32
    %c0_i32_0 = arith.constant 0 : i32
    %c0_i32_1 = arith.constant 0 : i32
    return %arg0, %c0_i32, %c0_i32_0 : i32, i32, i32
  }
}

</mosaic_0001>

<bundles_post_ra>
// kernel: tpu_custom_call.1
= control target key start
LH: loop header
LB: loop body
LE: loop exit
PB: predicated region body
PF: predicated region fallthrough
CT: control target
= control target key end

     0   :  { %9 = vsyncpa [#allocation3], 0  ;;  %s861_s0 = inlined_call_operand.hbm [shape: f32[2,4,256], index: 0, kind: input, shape index: {}]   ;;  %s862_s1 = inlined_call_operand.vmem [shape: f32[4,4], index: 1, kind: input, shape index: {}]   ;;  %s863_s2 = inlined_call_operand.vmem [shape: f32[4,1], index: 2, kind: input, shape index: {}]   ;;  %s864_s3 = inlined_call_operand.vmem [shape: f32[4,1], index: 3, kind: input, shape index: {}]   ;;  %s865_s4 = inlined_call_operand.hbm [shape: f32[2,4,256], index: 4, kind: output, shape index: {}]  }
   0x1   :  { %11 = vsyncpa [#allocation3 + $0x1], 0 }
   0x2   :  { %12 = vsyncpa [#allocation4], 0 }
   0x3   :  { %14 = vsyncpa [#allocation4 + $0x1], 0  ;;  %s666_s15 = smov 0   ;;  %s668_s16 = smov 0  }
   0x4   :  { %s670_s17 = smov 0   ;;  %s672_s18 = smov 0  }
   0x5 LB: > { %s687_s19 = sadd.s32 4294967295, %s633_s18   ;;  %s462_s20 = sadd.s32 4294967294, %s633_s18   ;;  %s633_s18 = sphi %s672_s18, %s880_s18   ;;  %s629_s17 = sphi %s670_s17, %s879_s17   ;;  %s625_s16 = sphi %s668_s16, %s878_s16   ;;  %s621_s15 = sphi %s666_s15, %s877_s15  }
   0x6   : > { %s691_s21 = sadd.s32 1, %s633_s18   ;;  %s27_s22 = sadd.s32 1, %s629_s17 }
   0x7   : > { %s24_s23 = ssub.s32 %s633_s18, %s691_s21  ;;  %p34_p0 = scmp.ne.s32.totalorder %s629_s17, %s625_s16 }
   0x8   : > { %p25_p1 = scmp.eq.s32.totalorder %s24_s23, 0  ;;  %p35_p2 = scmp.eq.s32.totalorder %s633_s18, 0 }
   0x9   : > { %p40_p3 = scmp.ne.s32.totalorder %s625_s16, %s621_s15  ;;  %p41_p4 = scmp.eq.s32.totalorder %s687_s19, 0 }
   0xa   : > { %s703_s24 = scalar_select %p25_p1, %s629_s17, %s27_s22  }
   0xb   : > { %p705_p5 = por %p35_p2, %p34_p0  ;;  %p709_p6 = por %p41_p4, %p40_p3 }
   0xc   : > { %p127_p7 = scmp.eq.s32.totalorder %s687_s19, 1  ;;  %p133_p8 = scmp.eq.s32.totalorder %s462_s20, 1 }
   0xd   : > { %p490_p10 = scmp.lt.s32.totalorder %s633_s18, 2  ;;  %s162_s29 = sand.u32 1, %s629_s17  }
   0xe   : > { %p716_p11 = por %p127_p7, %p34_p0  ;;  %p720_p12 = por %p133_p8, %p40_p3 }
   0xf   : > { %s476_s30 = sshll.u32 %s633_s18, 7  ;;  %s465_s5 = sshll.u32 %s162_s29, 3 }
  0x10   : > { %s869_s27 = scalar_select %p716_p11, 1, 0 }
  0x11   : > { %s870_s28 = scalar_select %p720_p12, 1, 0 }
  0x12   : > { %s729_s8 = scalar_lea.hbm %s861_s0, %s476_s30  ;;  %s166_s9 = scalar_lea.vmem [#allocation2], %s465_s5 }
  0x13   : > { %s174_s10 = sshll.u32 %s166_s9, 4  ;;  %p733_p13 = pnand %p490_p10, %p705_p5  ;;  %s737_s10 = int_to_ptr.vmem [resolvable:$true] %s174_s10 }
  0x14   : > { %s163_s12 = scalar_lea.sflag [#allocation3], %s162_s29  ;;  %s537_s13 = scalar_lea.hbm %s729_s8, 128 }
  0x15   : > { %p538_p2 = scmp.ne.s32.totalorder %s729_s8, %s537_s13  ;;  %p539_p3 = pneg %p733_p13 }
  0x16   : > { %s542_s22 = scalar_lea.hbm %s861_s0, 256  ;;  %p543_p5 = scmp.lt.u32.totalorder %s729_s8, %s861_s0 }
  0x17   : > { %p540_p4 = pnand %p539_p3, %p538_p2  ;;  %p544_p8 = scmp.lt.u32.totalorder %s542_s22, %s537_s13 }
  0x18   : > { %p546_p9 = scmp.lt.u32.totalorder %s537_s13, %s729_s8 }
  0x19   : > { %p541_p7 = pneg %p540_p4  ;;  %p545_p10 = por %p544_p8, %p543_p5 }
  0x1b   : > { %p547_p0 = por %p546_p9, %p545_p10 }
  0x1d   : > { %p548_p1 = pnand %p547_p0, %p541_p7 }
  0x1f   : > { %551 = shalt.err (!%p548_p1)
}
  0x20   : > { %s552_s29 = scalar_lea.vmem %s737_s10, 128  ;;  %s635_s30 = smov [#allocation2]  }
  0x21   : > { %p553_p2 = scmp.ne.s32.totalorder %s737_s10, %s552_s29  ;;  %s557_s5 = sshll.u32 %s635_s30, 4  ;;  %s558_s5 = int_to_ptr.vmem [resolvable:$false] %s557_s5 }
  0x22   : > { %s559_s6 = scalar_lea.vmem %s558_s5, 256  ;;  %p560_p11 = scmp.lt.s32.totalorder %s737_s10, %s558_s5 }
  0x23   : > { %p555_p4 = pnand %p553_p2, %p539_p3  ;;  %p561_p5 = scmp.lt.s32.totalorder %s559_s6, %s552_s29 }
  0x25   : > { %p556_p12 = pneg %p555_p4  ;;  %p562_p8 = por %p561_p5, %p560_p11 }
  0x27   : > { %p563_p9 = pnand %p562_p8, %p556_p12 }
  0x29   : > { %566 = shalt.err (!%p563_p9)
}
  0x2a   : > { %485 = dma.hbm_to_vmem [thread:$0]  (!%p733_p13), %s729_s8, 128, %s737_s10, %s163_s12  }
  0x2b   : > { %p872_p0 = scmp.lt.s32.totalorder %s633_s18, 3  ;;  %p873_p1 = scmp.ge.s32.totalorder %s633_s18, 1 }
  0x2d   : > { %p180_p3 = pnand %p873_p1, %p872_p0 }
  0x2e   : > { %s771_s7 = sand.u32 (!%p180_p3), 1, %s625_s16  }
  0x2f   : > { %183 = sbr.rel (%p180_p3) target bundleno = 391 (0x187), region = 36  ;;  %s469_s9 = sshll.u32 (!%p180_p3), %s771_s7, 3 }
  0x30   : > { %s186_s13 = scalar_lea.sflag (!%p180_p3), [#allocation3], %s771_s7  ;;  %s189_s11 = scalar_lea.vmem (!%p180_p3), [#allocation2], %s469_s9 }
  0x36   : > { %612 = dma.done.wait (%p709_p6), %s186_s13, 128  }
  0x37   : > { %614 = vsyncadd (%p709_p6), %s186_s13, 4294967168  ;;  %v636_v0 = vmov 0   ;;  %v637_v1 = vmov 2   ;;  %vm221_vm0 = vcmask 1043456   ;;  %v781_v2 = vld [vmem:[%s189_s11] sm:$0xff]  ;;  %v638_v12 = vmov 1  }
  0x38   : > { %528 = vset.pattern.permute.xlu1 %v636_v0  ;;  %530 = vset.pattern.permute.xlu0 %v637_v1  ;;  %v214_v3 = vld [vmem:[%s862_s1] sm:$0xf]  ;;  %v219_v4 = vcombine.high %v781_v2, %v781_v2  ;;  %v222_v5 = vsel %vm221_vm0, %v781_v2, 0.0  ;;  %v234_v6 = vmul.f32 %v781_v2, %v781_v2  ;;  %v639_v14 = vmov 3   ;;  %s477_s22 = sshll.u32 %s687_s19, 7  ;;  %s213_s23 = scalar_lea.vmem [#allocation5], %s469_s9 }
  0x39   : > { %259 = vperm.xlu1 %528, %v214_v3   ;;  %v262_v17 = vlaneseq  ;;  %s392_s25 = sshll.u32 %s213_s23, 4  ;;  %s817_s5 = scalar_lea.hbm %s865_s4, %s477_s22  ;;  %s819_s25 = int_to_ptr.vmem [resolvable:$true] %s392_s25 }
  0x3a   : > { %v223_v7 = vsel %vm221_vm0, %v219_v4, 0.0  ;;  %v236_v8 = vcombine.high %v234_v6, %v234_v6  ;;  %v238_v9 = vsel %vm221_vm0, %v234_v6, 0.0  ;;  %s378_s6 = scalar_lea.sflag [#allocation4], %s771_s7  ;;  %s567_s13 = scalar_lea.vmem %s819_s25, 128 }
  0x3b   : > { %v224_v10 = vadd.f32 %v223_v7, %v222_v5  ;;  %v263_v22 = vshrl.u32 %v262_v17, 7  ;;  %p568_p6 = scmp.ne.s32.totalorder %s819_s25, %s567_s13  ;;  %p874_p11 = scmp.ne.s32.totalorder %s869_s27, 0 }
  0x3c   : > { %v239_v11 = vsel %vm221_vm0, %v236_v8, 0.0  ;;  %s640_s19 = smov [#allocation5]  }
  0x3d   : > { %529 = vset.pattern.permute.xlu1 %v638_v12  ;;  %225 = vadd.xlane.f32.xlu0 %v224_v10  ;;  %v240_v13 = vadd.f32 %v239_v11, %v238_v9  ;;  %v264_v27 = vsub.s32 0, %v263_v22  ;;  %v268_v28 = vsub.s32 4, %v263_v22  ;;  %v288_v29 = vsub.s32 1, %v263_v22  ;;  %p569_p12 = pnand %p568_p6, %p874_p11  ;;  %s571_s9 = sshll.u32 %s640_s19, 4  ;;  %s572_s9 = int_to_ptr.vmem [resolvable:$false] %s571_s9 }
  0x3e   : > { %283 = vperm.xlu1 %529, %v214_v3   ;;  %v292_v30 = vsub.s32 5, %v263_v22  ;;  %v314_v36 = vsub.s32 2, %v263_v22  ;;  %v318_v37 = vsub.s32 6, %v263_v22  ;;  %v340_v44 = vsub.s32 3, %v263_v22  ;;  %s573_s11 = scalar_lea.vmem %s572_s9, 256  ;;  %p574_p7 = scmp.lt.s32.totalorder %s819_s25, %s572_s9 }
  0x3f   : > { %v265_v38 = vrot.slane %v781_v2, %v264_v27  ;;  %v269_v39 = vrot.slane %v781_v2, %v268_v28  ;;  %v289_v40 = vrot.slane %v781_v2, %v288_v29  ;;  %v344_v48 = vsub.s32 7, %v263_v22  ;;  %v216_v22 = vld [vmem:[%s864_s3] sm:$0xf]  ;;  %p570_p13 = pneg %p569_p12  ;;  %p575_p10 = scmp.lt.s32.totalorder %s573_s11, %s567_s13 }
  0x40   : > { %v293_v41 = vrot.slane %v781_v2, %v292_v30  ;;  %v315_v46 = vrot.slane %v781_v2, %v314_v36  ;;  %v319_v47 = vrot.slane %v781_v2, %v318_v37  ;;  %v341_v56 = vrot.slane %v781_v2, %v340_v44 }
  0x41   : > { %241 = vadd.xlane.f32.xlu0 %v240_v13  ;;  %v275_v49 = vrot.slane %v265_v38, %v264_v27  ;;  %v279_v50 = vrot.slane %v269_v39, %v264_v27  ;;  %v299_v51 = vrot.slane %v289_v40, %v288_v29  ;;  %v345_v60 = vrot.slane %v781_v2, %v344_v48  ;;  %p576_p2 = por %p575_p10, %p574_p7 }
  0x42   : > { %531 = vset.pattern.permute.xlu1 %v639_v14  ;;  %v303_v52 = vrot.slane %v293_v41, %v288_v29  ;;  %v325_v58 = vrot.slane %v315_v46, %v314_v36  ;;  %v329_v59 = vrot.slane %v319_v47, %v314_v36  ;;  %v351_v5 = vrot.slane %v341_v56, %v340_v44 }
  0x43   : > { %335 = vperm.xlu1 %531, %v214_v3   ;;  %v355_v6 = vrot.slane %v345_v60, %v340_v44  ;;  %p577_p4 = pnand %p576_p2, %p570_p13 }
  0x47   : > { %532 = vset.pattern.permute.xlu1 %v636_v0 }
  0x57   : > { %309 = vperm.xlu0 %530, %v214_v3  }
  0x5b   : > { %533 = vset.pattern.permute.xlu0 %v636_v0 }
  0xb8   : > { %v260_v35 = vpop.permute.xlu1 %259 }
  0xb9   : > { %v280_v61 = vmul.f32 %v275_v49, %v260_v35  ;;  %v281_v62 = vmul.f32 %v279_v50, %v260_v35 }
  0xbd   : > { %v284_v55 = vpop.permute.xlu1 %283 }
  0xbe   : > { %v304_v63 = vmul.f32 %v299_v51, %v284_v55  ;;  %v305_v0 = vmul.f32 %v303_v52, %v284_v55 }
  0xc0   : > { %v306_v7 = vadd.f32 %v304_v63, %v280_v61  ;;  %v307_v8 = vadd.f32 %v305_v0, %v281_v62 }
  0xc2   : > { %v336_v11 = vpop.permute.xlu1 %335 }
  0xc3   : > { %v356_v2 = vmul.f32 %v351_v5, %v336_v11  ;;  %v357_v14 = vmul.f32 %v355_v6, %v336_v11 }
  0xca   : > { %v226_v15 = vpop.xlane.xlu0 %225 }
  0xcb   : > { %v227_v16 = vsel %vm221_vm0, %v226_v15, 0.0 }
  0xcc   : > { %v228_v18 = vrot.slane %v227_v16, 4 }
  0xce   : > { %v229_v19 = vadd.f32 %v228_v18, %v227_v16  ;;  %v242_v20 = vpop.xlane.xlu0 %241  ;;  %v215_v18 = vld [vmem:[%s863_s2] sm:$0xf] }
  0xcf   : > { %v243_v21 = vsel %vm221_vm0, %v242_v20, 0.0 }
  0xd0   : > { %v230_v23 = vrot.slane %v229_v19, 2  ;;  %v244_v24 = vrot.slane %v243_v21, 4 }
  0xd2   : > { %v231_v25 = vadd.f32 %v230_v23, %v229_v19  ;;  %v245_v26 = vadd.f32 %v244_v24, %v243_v21 }
  0xd4   : > { %v232_v31 = vrot.slane %v231_v25, 1  ;;  %v246_v32 = vrot.slane %v245_v26, 2 }
  0xd6   : > { %v233_v33 = vadd.f32 %v232_v31, %v231_v25  ;;  %v247_v34 = vadd.f32 %v246_v32, %v245_v26  ;;  %v310_v3 = vpop.permute.xlu0 %309 }
  0xd7   : > { %v330_v9 = vmul.f32 %v325_v58, %v310_v3  ;;  %v331_v10 = vmul.f32 %v329_v59, %v310_v3 }
  0xd8   : > { %v250_v42 = vmul.f32 0.0009765625, %v233_v33  ;;  %v248_v43 = vrot.slane %v247_v34, 1 }
  0xd9   : > { %v332_v12 = vadd.f32 %v330_v9, %v306_v7  ;;  %v333_v13 = vadd.f32 %v331_v10, %v307_v8 }
  0xda   : > { %v249_v45 = vadd.f32 %v248_v43, %v247_v34  ;;  %v252_v53 = vmul.f32 %v250_v42, %v250_v42 }
  0xdb   : > { %v358_v15 = vadd.f32 %v356_v2, %v332_v12  ;;  %v359_v16 = vadd.f32 %v357_v14, %v333_v13 }
  0xdc   : > { %v251_v54 = vmul.f32 0.0009765625, %v249_v45 }
  0xde   : > { %v253_v57 = vsub.f32 %v251_v54, %v252_v53 }
  0xe0   : > { %v254_v1 = vmax.f32 %v253_v57, 0.0 }
  0xe2   : > { %v255_v4 = vadd.f32 1e-05, %v254_v1 }
  0xe4   : > { %535 = vrsqrt.f32 %v255_v4 }
  0xee   : > { %v536_v17 = vpop.eup %535 }
  0xef   : > { %v360_v19 = vmul.f32 %v536_v17, %v250_v42  ;;  %v363_v20 = vmul.f32 %v536_v17, %v358_v15  ;;  %v364_v21 = vmul.f32 %v536_v17, %v359_v16 }
  0xf1   : > { %v361_v23 = vmul.f32 %v360_v19, %v215_v18 }
  0xf3   : > { %v362_v24 = vsub.f32 %v216_v22, %v361_v23 }
  0xf5   : > { %367 = vperm.xlu1 %532, %v362_v24  }
 0x174   : > { %v368_v25 = vpop.permute.xlu1 %367 }
 0x175   : > { %v370_v26 = vadd.f32 %v368_v25, %v363_v20  ;;  %v371_v27 = vadd.f32 %v368_v25, %v364_v21 }
 0x177   : > { %v374_v28 = vcombine.low %v370_v26, %v371_v27 }
 0x179   : > { %376 = vst [vmem:[%s213_s23] sm:$0xff] %v374_v28 }
 0x17a   : > { %580 = shalt.err (!%p577_p4)
}
 0x17b   : > { %s581_s7 = scalar_lea.hbm %s817_s5, 128  ;;  %s585_s26 = scalar_lea.hbm %s865_s4, 256 }
 0x17c   : > { %p582_p5 = scmp.ne.s32.totalorder %s817_s5, %s581_s7  ;;  %p586_p0 = scmp.lt.u32.totalorder %s817_s5, %s865_s4 }
 0x17d   : > { %p587_p1 = scmp.lt.u32.totalorder %s585_s26, %s581_s7  ;;  %p589_p6 = scmp.lt.u32.totalorder %s581_s7, %s817_s5 }
 0x17e   : > { %p583_p8 = pnand %p582_p5, %p874_p11 }
 0x17f   : > { %p588_p3 = por %p587_p1, %p586_p0 }
 0x180   : > { %p584_p9 = pneg %p583_p8 }
 0x181   : > { %p590_p12 = por %p589_p6, %p588_p3 }
 0x183   : > { %p591_p13 = pnand %p590_p12, %p584_p9 }
 0x185   : > { %594 = shalt.err (!%p591_p13)
}
 0x186   : > { %480 = dma.vmem_to_hbm [thread:$0]  (%p874_p11), %s819_s25, 128, %s817_s5, %s378_s6  }
 0x187 PF: > { %s404_s20 = sand.u32 1, %s621_s15   ;;  %p875_p7 = scmp.ne.s32.totalorder %s870_s28, 0 }
 0x188   : > { %p876_p10 = scmp.ge.s32.totalorder %s633_s18, 2  ;;  %s405_s22 = scalar_lea.sflag [#allocation4], %s404_s20 }
 0x18a   : > { %p487_p2 = pnand %p876_p10, %p875_p7 }
 0x18c   : > { %616 = dma.done.wait (!%p487_p2), %s405_s22, 128  }
 0x18d   : > { %618 = vsyncadd (!%p487_p2), %s405_s22, 4294967168  ;;  %p17_p4 = scmp.ge.s32.totalorder %s691_s21, 4   ;;  %s877_s15 = smov %s625_s16 }
 0x18e   : > { %s878_s16 = smov %s629_s17  ;;  %s879_s17 = smov %s703_s24 }
 0x18f   : > { %s880_s18 = smov %s691_s21  ;;  %19 = sbr.rel (!%p17_p4) target bundleno = 5 (0x5), region = 81 }
 0x196   :  { %410 = vsyncpa [#allocation3], 1 }
 0x197   :  { %412 = vsyncpa [#allocation3 + $0x1], 1 }
 0x198   :  { %413 = vsyncpa [#allocation4], 1 }
 0x199   :  { %415 = vsyncpa [#allocation4 + $0x1], 1 }

</bundles_post_ra>
